<compile_context>
chip_gen: v5e
topology: v5e:2x2
jax: 0.10.0
libtpu: 0.0.40
codegen_flags: <defaults>
</compile_context>

<pallas_src>
import functools

import numpy as np
import jax
import jax.numpy as jnp
from jax import lax
from jax.experimental import pallas as pl
from jax.experimental.pallas import tpu as pltpu

_SUBLANE = 8
_LANE = 128


def _round_up(x, m):
    return (x + m - 1) // m * m


def _conv2d_flat_kernel(w_ref, x_ref, o_ref, *, k, w_img, strip, n_strips,
                        uniform):
    """One lane-dense slab (nb images, one flat H*W row each) per grid step.

    w_ref : (k*k,)   conv weight, SMEM (scalar reads, hoisted)
    x_ref : (nb, Lp) flat-image slab, VMEM
    o_ref : (nb, Lp) output slab, VMEM (valid region sliced by the wrapper)

    Correctness of the lane-roll formulation: for a valid output position
    p = r*W + c (r < H_out, c < W_out) and any tap offset off = di*W + dj,
    p + off <= (H-1)*W + W-1 = H*W-1 < Lp, so the circular roll never wraps
    for valid p and the flat index never crosses a row boundary (c+dj < W).
    Wrapped / cross-row / zero-padded reads only land at positions the
    wrapper discards (r >= H_out, c >= W_out, or lane >= H*W).
    """
    lp = x_ref.shape[1]

    # Hoist the k*k SMEM weight reads (and their implied splats) out of the
    # strip loop -- JAX does not CSE them per iteration.
    if uniform:
        w0 = w_ref[0]
        w_taps = None
    else:
        w0 = None
        w_taps = [w_ref[t] for t in range(k * k)]

    def strip_body(s, carry):
        r0 = s * strip
        if not isinstance(r0, int):
            r0 = pl.multiple_of(r0, strip)
        x = x_ref[pl.ds(r0, strip), :]                       # (strip, Lp) vregs

        if uniform:
            # Separable all-ones path: running column sum then running row sum.
            row = x
            for dj in range(1, k):
                row = row + pltpu.roll(x, lp - dj, axis=1)          # XLU
            acc = row
            for di in range(1, k):
                acc = acc + pltpu.roll(row, lp - di * w_img, axis=1)  # XLU
            acc = acc * w0
        else:
            # General path: one accumulator per di breaks the serial MAC chain
            # (k short chains instead of one k^2-long chain -> fills VALU slots).
            acc = None
            for di in range(k):
                a = None
                for dj in range(k):
                    off = di * w_img + dj
                    xs = x if off == 0 else pltpu.roll(x, lp - off, axis=1)
                    t = xs * w_taps[di * k + dj]                    # VPU MAC
                    a = t if a is None else a + t
                acc = a if acc is None else acc + a

        o_ref[pl.ds(r0, strip), :] = acc.astype(o_ref.dtype)
        return carry

    if n_strips == 1:
        strip_body(0, 0)
    else:
        lax.fori_loop(0, n_strips, strip_body, 0, unroll=(n_strips <= 4))


def conv2d_1x1ch_pallas(x_nhw, weight_kk):
    """Valid 2D cross-correlation, single in/out channel, stride 1, no bias.

    x_nhw     : (N, H, W) float32
    weight_kk : (k, k)    float32
    returns   : (N, H-k+1, W-k+1) float32
    """
    n, h, w = x_nhw.shape
    k = int(weight_kk.shape[0])
    assert 1 <= k <= h and k <= w, "kernel larger than the image"
    h_out, w_out = h - k + 1, w - k + 1
    hw = h * w

    # ---- geometry ---------------------------------------------------------
    lp = _round_up(hw, _LANE)        # lane-padded flat image width
    # TODO(synk): for very large single images (H*W*4 of several MiB) the lane
    # axis should additionally be chunked with a (k-1)*(W+1)-lane halo.

    # Images (sublane rows) per grid step, sized from a VMEM budget:
    # ~2 MiB input slab -> in+out double-buffered ~8 MiB, well inside the
    # 16/32 MiB scoped defaults (v5e / v6e+v7x).
    slab_target = 2 << 20
    nb = max(_SUBLANE, (slab_target // (lp * 4)) // _SUBLANE * _SUBLANE)
    n8 = _round_up(n, _SUBLANE)
    nb = min(nb, n8)
    # Keep >=2 grid steps when the batch allows it (v7x: 2 TensorCores share
    # the 1-axis "parallel" grid).
    if n8 >= 2 * _SUBLANE:
        nb = min(nb, _round_up(pl.cdiv(n8, 2), _SUBLANE))
    n_blocks = pl.cdiv(n, nb)
    n_pad = n_blocks * nb

    # Sublane strip processed per inner-loop iteration (keep each live value
    # at <= ~8 vregs so rolls/accumulators stay register-resident).
    strip = _SUBLANE
    for cand in (32, 16, 8):
        if nb % cand == 0 and cand * lp * 4 <= 32 * 1024:
            strip = cand
            break
    n_strips = nb // strip

    # ---- pack: free row-major reshape + zero pad only where needed ---------
    x_flat = x_nhw.reshape(n, hw)
    if n_pad != n or lp != hw:
        x_flat = jnp.pad(x_flat, ((0, n_pad - n), (0, lp - hw)))

    # Uniform-weight (all-ones) separable fast path, taken only when the
    # weight is concrete (always true for testNet's ones-init); under jit
    # tracing it silently falls back to the general tap loop.
    try:
        wv = np.asarray(weight_kk)
        uniform = bool((wv == wv.reshape(-1)[0]).all())
    except Exception:
        uniform = False

    kernel = functools.partial(
        _conv2d_flat_kernel, k=k, w_img=w, strip=strip, n_strips=n_strips,
        uniform=uniform)

    slab_bytes = nb * lp * 4
    vmem_limit = int(min(96 << 20, max(8 << 20, 6 * slab_bytes)))

    out_flat = pl.pallas_call(
        kernel,
        out_shape=jax.ShapeDtypeStruct((n_pad, lp), x_nhw.dtype),
        grid=(n_blocks,),
        in_specs=[
            pl.BlockSpec(memory_space=pltpu.SMEM),          # weight (k*k,)
            pl.BlockSpec((nb, lp), lambda i: (i, 0)),       # flat-image slab
        ],
        out_specs=pl.BlockSpec((nb, lp), lambda i: (i, 0)),
        compiler_params=pltpu.CompilerParams(
            dimension_semantics=("parallel",),
            vmem_limit_bytes=vmem_limit),
        # If profiles ever show exposed per-step DMA latency, sweep
        # pipeline_mode=pl.Buffered(3) on the input BlockSpec.
    )(weight_kk.reshape(-1), x_flat)

    # Valid-region extraction: one output-sized strided slice (XLA fuses the
    # row/lane slice, reshape and spatial crop into a single copy).
    out = out_flat[:n, :hw].reshape(n, h, w)[:, :h_out, :w_out]
    return out


def test_net_forward(x_nchw, weight):
    """Equivalent of testNet(k_s).forward(x) for NCHW input with C=1.

    x_nchw : (N, 1, H, W)
    weight : (1, 1, k, k)   (torch Conv2d weight layout; init'd to ones)
    """
    n, c, h, w = x_nchw.shape
    assert c == 1
    y = conv2d_1x1ch_pallas(x_nchw[:, 0, :, :], weight[0, 0])
    return y[:, None, :, :]


def _reference(x_nchw, weight):
    return lax.conv_general_dilated(
        x_nchw, weight,
        window_strides=(1, 1),
        padding="VALID",
        dimension_numbers=("NCHW", "OIHW", "NCHW"),
    )


if __name__ == "__main__":
    key = jax.random.PRNGKey(0)
    k0, k1, k2, k3 = jax.random.split(key, 4)

    # --- primary: the module's configuration (ones weight, C=1) -------------
    N, C, H, W = 2, 1, 16, 16
    K_S = 3
    x = jax.random.normal(k0, (N, C, H, W), dtype=jnp.float32)
    weight = jnp.ones((1, 1, K_S, K_S), dtype=jnp.float32)  # constant_(w, 1)

    out = jax.block_until_ready(test_net_forward(x, weight))
    ref = _reference(x, weight)
    assert out.shape == (N, 1, H - K_S + 1, W - K_S + 1), out.shape
    assert jnp.allclose(out, ref, atol=1e-4, rtol=1e-5), "mismatch (ones)"

    # --- secondary: larger batch (padding, 2 parallel blocks, uniform path) -
    x2 = jax.random.normal(k1, (20, 1, 16, 16), dtype=jnp.float32)
    out2 = jax.block_until_ready(test_net_forward(x2, weight))
    assert jnp.allclose(out2, _reference(x2, weight), atol=1e-4, rtol=1e-5), \
        "mismatch (batch=20)"

    # --- secondary: non-uniform weight exercises the general tap path -------
    x3 = jax.random.normal(k2, (10, 1, 12, 12), dtype=jnp.float32)
    w3 = jax.random.normal(k3, (1, 1, K_S, K_S), dtype=jnp.float32)
    out3 = jax.block_until_ready(test_net_forward(x3, w3))
    assert jnp.allclose(out3, _reference(x3, w3), atol=1e-4, rtol=1e-5), \
        "mismatch (general weight)"

    print("KERNEL_OK")
</pallas_src>

<mosaic_0001>
module attributes {stable_mosaic.version = 11 : i64} {
  func.func @_conv2d_flat_kernel(%arg0: i32, %arg1: memref<9xf32, #tpu.memory_space<smem>>, %arg2: memref<8x256xf32, #tpu.memory_space<vmem>>, %arg3: memref<8x256xf32, #tpu.memory_space<vmem>>) attributes {dimension_semantics = [#tpu.dimension_semantics<parallel>], iteration_bounds = array<i64: 1>, scalar_prefetch = 0 : i64, scratch_operands = 0 : i64, tpu.core_type = #tpu.core_type<tc>, window_params = [{transform_indices = @transform_0, window_bounds = array<i64: 9>}, {transform_indices = @transform_1, window_bounds = array<i64: 8, 256>}, {transform_indices = @transform_2, window_bounds = array<i64: 8, 256>}]} {
    %c0 = arith.constant 0 : index
    %0 = memref.load %arg1[%c0] : memref<9xf32, #tpu.memory_space<smem>>
    %c0_0 = arith.constant 0 : index
    %c0_1 = arith.constant 0 : index
    %1 = vector.load %arg2[%c0_0, %c0_1] : memref<8x256xf32, #tpu.memory_space<vmem>>, vector<8x256xf32>
    %c255_i32 = arith.constant 255 : i32
    %2 = tpu.dynamic_rotate %1 by %c255_i32 dim 1 : vector<8x256xf32>, i32 -> vector<8x256xf32>
    %3 = arith.addf %1, %2 : vector<8x256xf32>
    %c254_i32 = arith.constant 254 : i32
    %4 = tpu.dynamic_rotate %1 by %c254_i32 dim 1 : vector<8x256xf32>, i32 -> vector<8x256xf32>
    %5 = arith.addf %3, %4 : vector<8x256xf32>
    %c240_i32 = arith.constant 240 : i32
    %6 = tpu.dynamic_rotate %5 by %c240_i32 dim 1 : vector<8x256xf32>, i32 -> vector<8x256xf32>
    %7 = arith.addf %5, %6 : vector<8x256xf32>
    %c224_i32 = arith.constant 224 : i32
    %8 = tpu.dynamic_rotate %5 by %c224_i32 dim 1 : vector<8x256xf32>, i32 -> vector<8x256xf32>
    %9 = arith.addf %7, %8 : vector<8x256xf32>
    %10 = vector.broadcast %0 : f32 to vector<8x256xf32>
    %11 = arith.mulf %9, %10 : vector<8x256xf32>
    %c0_2 = arith.constant 0 : index
    %c0_3 = arith.constant 0 : index
    %12 = vector.load %arg3[%c0_2, %c0_3] : memref<8x256xf32, #tpu.memory_space<vmem>>, vector<8x256xf32>
    tpu.vector_store %arg3[%c0_2, %c0_3], %11 {strides = array<i32>} : memref<8x256xf32, #tpu.memory_space<vmem>>, vector<8x256xf32>,
    return
  }
  func.func @transform_0(%arg0: i32) -> i32 {
    %c0_i32 = arith.constant 0 : i32
    %c0_i32_0 = arith.constant 0 : i32
    return %c0_i32 : i32
  }
  func.func @transform_1(%arg0: i32) -> (i32, i32) {
    %c0_i32 = arith.constant 0 : i32
    %c0_i32_0 = arith.constant 0 : i32
    return %arg0, %c0_i32 : i32, i32
  }
  func.func @transform_2(%arg0: i32) -> (i32, i32) {
    %c0_i32 = arith.constant 0 : i32
    %c0_i32_0 = arith.constant 0 : i32
    return %arg0, %c0_i32 : i32, i32
  }
}

</mosaic_0001>

<bundles_post_ra>
// kernel: tpu_custom_call.1
= control target key start
LH: loop header
LB: loop body
LE: loop exit
PB: predicated region body
PF: predicated region fallthrough
CT: control target
= control target key end

     0   :  { %7 = vsyncpa [#allocation5], 0  ;;  %s207_s0 = inlined_call_operand.hbm [shape: f32[9], index: 0, kind: input, shape index: {}]   ;;  %s208_s1 = inlined_call_operand.hbm [shape: f32[8,256], index: 1, kind: input, shape index: {}]   ;;  %s209_s2 = inlined_call_operand.hbm [shape: f32[8,256], index: 2, kind: output, shape index: {}]  }
   0x1   :  { %8 = vsyncpa [#allocation3], 0 }
   0x2   :  { %9 = vsyncpa [#allocation4], 0  ;;  %s15_s11 = sshll.u32 %s207_s0, 4  ;;  %s24_s14 = sshll.u32 %s208_s1, 4  ;;  %s16_s11 = int_to_ptr.hbm [resolvable:$true] %s15_s11  ;;  %s25_s14 = int_to_ptr.hbm [resolvable:$true] %s24_s14 }
   0x3   :  { %s176_s15 = smov [#allocation2]   ;;  %s177_s16 = smov [#allocation6]  }
   0x4   :  { %18 = dma.hbm_to_smem %s16_s11, 16, %s176_s15, [#allocation5]  }
   0x5   :  { %s26_s17 = sshll.u32 %s177_s16, 4  ;;  %s27_s17 = int_to_ptr.vmem [resolvable:$true] %s26_s17 }
   0x6   :  { %29 = dma.hbm_to_vmem [thread:$0]  %s25_s14, 256, %s27_s17, [#allocation3]  }
   0x7   :  { %170 = dma.done.wait [#allocation5], 16  }
   0x8   :  { %171 = vsyncadd [#allocation5], 4294967280 }
   0x9   :  { %172 = dma.done.wait [#allocation3], 256  }
   0xa   :  { %173 = vsyncadd [#allocation3], 4294967040 }
   0xb   :  { %38 = sfence }
   0xc   :  { %v40_v0 = vld [vmem:[#allocation6] sm:$0xff]  ;;  %s178_s18 = smov 126   ;;  %s179_s0 = smov 127   ;;  %v41_v1 = vld [vmem:[#allocation6 + $0x8] sm:$0xff]  ;;  %v46_v2 = vlaneseq }
   0xd   :  { %53 = vrot.lane.b32.xlu1 %v40_v0, %s178_s18  ;;  %42 = vrot.lane.b32.xlu0 %v40_v0, %s179_s0  ;;  %s180_s1 = smov 96   ;;  %s181_s19 = smov 112  }
   0xe   :  { %v47_v5 = vand.u32 127, %v46_v2  ;;  %s39_s20 = sld [smem:[#allocation2]]  ;;  %s182_s21 = smov [#allocation7]  }
   0xf   :  { %s90_s22 = sshll.u32 %s182_s21, 4  ;;  %s92_s25 = sshll.u32 %s209_s2, 4  ;;  %s91_s22 = int_to_ptr.vmem [resolvable:$true] %s90_s22  ;;  %s93_s25 = int_to_ptr.hbm [resolvable:$true] %s92_s25 }
  0x10   :  { %vm48_vm0 = vcmp.lt.s32.totalorder %v47_v5, 127  ;;  %vm57_vm1 = vcmp.lt.s32.totalorder %v47_v5, 126  ;;  %vm66_vm2 = vcmp.lt.s32.totalorder %v47_v5, 112  ;;  %vm75_vm3 = vcmp.lt.s32.totalorder %v47_v5, 96 }
  0x14   :  { %v80_v26 = vstv %s39_s20 }
  0x15   :  { %55 = vrot.lane.b32.xlu1 %v41_v1, %s178_s18  ;;  %44 = vrot.lane.b32.xlu0 %v41_v1, %s179_s0 }
  0x7f   :  { %v54_v3 = vpop.permute.xlu1 %53  ;;  %v43_v4 = vpop.permute.xlu0 %42 }
  0x87   :  { %v56_v6 = vpop.permute.xlu1 %55  ;;  %v45_v7 = vpop.permute.xlu0 %44 }
  0x88   :  { %v49_v8 = vsel %vm48_vm0, %v43_v4, %v45_v7  ;;  %v50_v9 = vsel %vm48_vm0, %v45_v7, %v43_v4  ;;  %v58_v12 = vsel %vm57_vm1, %v54_v3, %v56_v6  ;;  %v59_v13 = vsel %vm57_vm1, %v56_v6, %v54_v3 }
  0x89   :  { %v51_v10 = vadd.f32 %v49_v8, %v40_v0  ;;  %v52_v11 = vadd.f32 %v50_v9, %v41_v1 }
  0x8b   :  { %v61_v14 = vadd.f32 %v59_v13, %v52_v11  ;;  %v60_v15 = vadd.f32 %v58_v12, %v51_v10 }
  0x8d   :  { %73 = vrot.lane.b32.xlu1 %v61_v14, %s180_s1  ;;  %71 = vrot.lane.b32.xlu0 %v60_v15, %s180_s1 }
  0x8e   :  { %62 = vrot.lane.b32.xlu2 %v60_v15, %s181_s19 }
  0x96   :  { %64 = vrot.lane.b32.xlu2 %v61_v14, %s181_s19 }
  0xe8   :  { %v63_v16 = vpop.permute.xlu2 %62 }
  0xf0   :  { %v65_v17 = vpop.permute.xlu2 %64 }
  0xf1   :  { %v67_v18 = vsel %vm66_vm2, %v63_v16, %v65_v17  ;;  %v68_v19 = vsel %vm66_vm2, %v65_v17, %v63_v16 }
  0xf2   :  { %v69_v20 = vadd.f32 %v67_v18, %v60_v15  ;;  %v70_v21 = vadd.f32 %v68_v19, %v61_v14 }
  0xff   :  { %v74_v22 = vpop.permute.xlu1 %73  ;;  %v72_v23 = vpop.permute.xlu0 %71 }
 0x100   :  { %v76_v24 = vsel %vm75_vm3, %v72_v23, %v74_v22  ;;  %v77_v25 = vsel %vm75_vm3, %v74_v22, %v72_v23 }
 0x101   :  { %v78_v27 = vadd.f32 %v76_v24, %v69_v20  ;;  %v79_v28 = vadd.f32 %v77_v25, %v70_v21 }
 0x103   :  { %v81_v29 = vmul.f32 %v80_v26, %v78_v27  ;;  %v82_v30 = vmul.f32 %v80_v26, %v79_v28 }
 0x105   :  { %83 = vst [vmem:[#allocation7] sm:$0xff] %v81_v29 }
 0x106   :  { %84 = vst [vmem:[#allocation7 + $0x8] sm:$0xff] %v82_v30 }
 0x107   :  { %95 = dma.vmem_to_hbm [thread:$0]  %s91_s22, 256, %s93_s25, [#allocation4]  }
 0x108   :  { %174 = dma.done.wait [#allocation4], 256  }
 0x109   :  { %175 = vsyncadd [#allocation4], 4294967040 }
 0x10a   :  { %100 = vsyncpa [#allocation3], 1 }
 0x10b   :  { %101 = vsyncpa [#allocation4], 1 }
 0x10c   :  { %102 = vsyncpa [#allocation5], 1 }

</bundles_post_ra>
